<compile_context>
chip_gen: v5e
topology: v5e:2x2
jax: 0.10.0
libtpu: 0.0.40
codegen_flags: <defaults>
</compile_context>

<pallas_src>
import jax
import jax.numpy as jnp
from jax.experimental import pallas as pl
from jax.experimental.pallas import tpu as pltpu


NUM_ROOMS = 30  # len(ROOM2IND)


def _round_up(x, m):
    return ((x + m - 1) // m) * m


def _room_pred_kernel(x_ref, w_ref, b_ref, out_ref):
    """x_ref:[TN, D], w_ref:[D, R], b_ref:[1, R], out_ref:[TN, R]."""
    y = jnp.dot(x_ref[...], w_ref[...], preferred_element_type=jnp.float32)  # [TN, R]
    out_ref[...] = (y + b_ref[...]).astype(out_ref.dtype)


def room_prediction_img(view_feat, weights, biases, *, tile_n=512):
    """view_feat: [..., D], weights: [R, O, D], biases: [R, O] -> [..., R]."""
    lead_shape = view_feat.shape[:-1]
    d = view_feat.shape[-1]
    r = weights.shape[0]

    # Fold the per-room output-dim reduction into the parameters (exact in f32).
    w_eff_t = jnp.sum(weights.astype(jnp.float32), axis=1).T          # [D, R]
    b_eff = jnp.sum(biases.astype(jnp.float32), axis=1).reshape(1, r)  # [1, R]

    x = view_feat.reshape(-1, d).astype(jnp.float32)
    n = x.shape[0]

    # Tile the row axis: multiple of 8 sublanes, capped at tile_n; pad N up.
    tn = min(tile_n, _round_up(n, 8))
    n_pad = _round_up(n, tn)
    if n_pad != n:
        x = jnp.pad(x, ((0, n_pad - n), (0, 0)))
    grid = (n_pad // tn,)

    out = pl.pallas_call(
        _room_pred_kernel,
        out_shape=jax.ShapeDtypeStruct((n_pad, r), jnp.float32),
        grid_spec=pltpu.PrefetchScalarGridSpec(
            num_scalar_prefetch=0,
            grid=grid,
            in_specs=[
                pl.BlockSpec((tn, d), lambda i: (i, 0)),   # x tile, pipelined over N
                pl.BlockSpec((d, r), lambda i: (0, 0)),    # folded weights, resident
                pl.BlockSpec((1, r), lambda i: (0, 0)),    # folded bias, resident
            ],
            out_specs=pl.BlockSpec((tn, r), lambda i: (i, 0)),
        ),
        compiler_params=pltpu.CompilerParams(
            dimension_semantics=("parallel",),
            vmem_limit_bytes=64 * 1024 * 1024,
        ),
        cost_estimate=pl.CostEstimate(
            flops=2 * n_pad * d * r,
            transcendentals=0,
            bytes_accessed=4 * (n_pad * d + n_pad * r + d * r + r),
        ),
    )(x, w_eff_t, b_eff)

    return out[:n].reshape(*lead_shape, r)


def _reference(view_feat, weights, biases):
    # Pure-JAX reference mirroring the PyTorch per-room loop exactly.
    outs = []
    for r in range(weights.shape[0]):
        y = view_feat @ weights[r].T + biases[r]          # [..., O]
        outs.append(jnp.sum(y, axis=-1, keepdims=True))   # [..., 1]
    return jnp.concatenate(outs, axis=-1)                 # [..., R]


if __name__ == "__main__":
    # Small shapes consistent with the module's forward.
    B, S = 2, 8          # batch, sequence of views
    INPUT_SIZE = 32      # input_size (image_feat_size)
    OUTPUT_SIZE = 16     # output_size (rows of each room-embedding linear)
    R = NUM_ROOMS

    key = jax.random.PRNGKey(0)
    k_x, k_w, k_b = jax.random.split(key, 3)

    view_feat = jax.random.normal(k_x, (B, S, INPUT_SIZE), dtype=jnp.float32)
    # Deterministic synthetic parameters (stand-in for the h5py room embeddings
    # and the default nn.Linear biases).
    weights = jax.random.normal(k_w, (R, OUTPUT_SIZE, INPUT_SIZE), dtype=jnp.float32) * 0.05
    biases = jax.random.normal(k_b, (R, OUTPUT_SIZE), dtype=jnp.float32) * 0.01

    out = room_prediction_img(view_feat, weights, biases)
    out = jax.block_until_ready(out)

    ref = _reference(view_feat, weights, biases)
    assert out.shape == (B, S, R), out.shape
    assert jnp.allclose(out, ref, atol=1e-4, rtol=1e-4), "mismatch vs reference"

    print("KERNEL_OK")
</pallas_src>

<mosaic_0001>
module attributes {stable_mosaic.version = 11 : i64} {
  func.func @_room_pred_kernel(%arg0: i32, %arg1: memref<16x32xf32, #tpu.memory_space<vmem>>, %arg2: memref<32x30xf32, #tpu.memory_space<vmem>>, %arg3: memref<1x30xf32, #tpu.memory_space<vmem>>, %arg4: memref<16x30xf32, #tpu.memory_space<vmem>>) attributes {dimension_semantics = [#tpu.dimension_semantics<parallel>], iteration_bounds = array<i64: 1>, scalar_prefetch = 0 : i64, scratch_operands = 0 : i64, tpu.core_type = #tpu.core_type<tc>, window_params = [{transform_indices = @transform_0, window_bounds = array<i64: 16, 32>}, {pipeline_mode = #tpu.pipeline_mode<synchronous>, transform_indices = @transform_1, window_bounds = array<i64: 32, 30>}, {pipeline_mode = #tpu.pipeline_mode<synchronous>, transform_indices = @transform_2, window_bounds = array<i64: 1, 30>}, {transform_indices = @transform_3, window_bounds = array<i64: 16, 30>}]} {
    %c0 = arith.constant 0 : index
    %c0_0 = arith.constant 0 : index
    %0 = vector.load %arg1[%c0, %c0_0] : memref<16x32xf32, #tpu.memory_space<vmem>>, vector<16x32xf32>
    %c0_1 = arith.constant 0 : index
    %c0_2 = arith.constant 0 : index
    %1 = vector.load %arg2[%c0_1, %c0_2] : memref<32x30xf32, #tpu.memory_space<vmem>>, vector<32x30xf32>
    %cst = arith.constant dense<0.000000e+00> : vector<16x30xf32>
    %2 = tpu.matmul %0, %1, %cst {dimension_numbers = #tpu.dot_dimension_numbers<[1], [0], [0], [1], [0, 0, 1, 1], [], []>} : vector<16x32xf32>, vector<32x30xf32>, vector<16x30xf32> -> vector<16x30xf32>
    %c0_3 = arith.constant 0 : index
    %c0_4 = arith.constant 0 : index
    %3 = vector.load %arg3[%c0_3, %c0_4] : memref<1x30xf32, #tpu.memory_space<vmem>>, vector<1x30xf32>
    %4 = vector.broadcast %3 : vector<1x30xf32> to vector<16x30xf32>
    %5 = arith.addf %2, %4 : vector<16x30xf32>
    %c0_5 = arith.constant 0 : index
    %c0_6 = arith.constant 0 : index
    %6 = vector.load %arg4[%c0_5, %c0_6] : memref<16x30xf32, #tpu.memory_space<vmem>>, vector<16x30xf32>
    tpu.vector_store %arg4[%c0_5, %c0_6], %5 {strides = array<i32>} : memref<16x30xf32, #tpu.memory_space<vmem>>, vector<16x30xf32>,
    return
  }
  func.func @transform_0(%arg0: i32) -> (i32, i32) {
    %c0_i32 = arith.constant 0 : i32
    %c0_i32_0 = arith.constant 0 : i32
    return %arg0, %c0_i32 : i32, i32
  }
  func.func @transform_1(%arg0: i32) -> (i32, i32) {
    %c0_i32 = arith.constant 0 : i32
    %c0_i32_0 = arith.constant 0 : i32
    %c0_i32_1 = arith.constant 0 : i32
    return %c0_i32, %c0_i32_0 : i32, i32
  }
  func.func @transform_2(%arg0: i32) -> (i32, i32) {
    %c0_i32 = arith.constant 0 : i32
    %c0_i32_0 = arith.constant 0 : i32
    %c0_i32_1 = arith.constant 0 : i32
    return %c0_i32, %c0_i32_0 : i32, i32
  }
  func.func @transform_3(%arg0: i32) -> (i32, i32) {
    %c0_i32 = arith.constant 0 : i32
    %c0_i32_0 = arith.constant 0 : i32
    return %arg0, %c0_i32 : i32, i32
  }
}

</mosaic_0001>

<bundles_post_ra>
// kernel: tpu_custom_call.1
= control target key start
LH: loop header
LB: loop body
LE: loop exit
PB: predicated region body
PF: predicated region fallthrough
CT: control target
= control target key end

     0   :  { %8 = vsyncpa [#allocation3], 0  ;;  %s246_s0 = inlined_call_operand.hbm [shape: f32[16,32], index: 0, kind: input, shape index: {}]   ;;  %s247_s1 = inlined_call_operand.hbm [shape: f32[32,30], index: 1, kind: input, shape index: {}]   ;;  %s248_s2 = inlined_call_operand.vmem [shape: f32[1,30], index: 2, kind: input, shape index: {}]   ;;  %s249_s3 = inlined_call_operand.hbm [shape: f32[16,30], index: 3, kind: output, shape index: {}]  }
   0x1   :  { %9 = vsyncpa [#allocation6], 0 }
   0x2   :  { %10 = vsyncpa [#allocation4], 0  ;;  %s15_s14 = sshll.u32 %s246_s0, 4  ;;  %s200_s15 = smov [#allocation2]   ;;  %s16_s14 = int_to_ptr.hbm [resolvable:$true] %s15_s14 }
   0x3   :  { %s17_s16 = sshll.u32 %s200_s15, 4  ;;  %s28_s19 = sshll.u32 %s247_s1, 4  ;;  %s18_s16 = int_to_ptr.vmem [resolvable:$true] %s17_s16  ;;  %s29_s19 = int_to_ptr.hbm [resolvable:$true] %s28_s19 }
   0x4   :  { %s201_s20 = smov 128   ;;  %s202_s21 = smov 8  }
   0x5   :  { %23 = dma.hbm_to_vmem [thread:$0]  %s16_s14, 256, %s18_s16, [#allocation3], %s201_s20, %s201_s20, %s202_s21  }
   0x6   :  { %s203_s22 = smov [#allocation5]  }
   0x7   :  { %s30_s23 = sshll.u32 %s203_s22, 4  ;;  %s31_s23 = int_to_ptr.vmem [resolvable:$true] %s30_s23 }
   0x8   :  { %36 = dma.hbm_to_vmem [thread:$0]  %s29_s19, 512, %s31_s23, [#allocation6], %s201_s20, %s201_s20, %s202_s21  }
   0x9   :  { %194 = dma.done.wait [#allocation3], 256  }
   0xa   :  { %195 = vsyncadd [#allocation3], 4294967040 }
   0xb   :  { %196 = dma.done.wait [#allocation6], 512  }
   0xc   :  { %197 = vsyncadd [#allocation6], 4294966784  ;;  %v52_v0 = vld [vmem:[#allocation5 + $0x18] sm:$0xff]  ;;  %v51_v1 = vld [vmem:[#allocation5 + $0x10] sm:$0xff]  ;;  %vm57_vm0 = vcmask 261120   ;;  %s204_s24 = smov [#allocation7]  }
   0xd   :  { %76 = vmatpush.msra.mxu0 %v52_v0  ;;  %112 = vmatpush.msra.mxu1 %v52_v0  ;;  %v50_v2 = vld [vmem:[#allocation5 + $0x8] sm:$0xff]  ;;  %v49_v3 = vld [vmem:[#allocation5] sm:$0xff]  ;;  %v47_v4 = vld [vmem:[#allocation2] sm:$0xff]  ;;  %s94_s25 = sshll.u32 %s204_s24, 4  ;;  %s96_s28 = sshll.u32 %s249_s3, 4  ;;  %vm87_vm1 = vcmask 244736   ;;  %s95_s25 = int_to_ptr.vmem [resolvable:$true] %s94_s25  ;;  %s97_s28 = int_to_ptr.hbm [resolvable:$true] %s96_s28 }
   0xe   :  { %v48_v5 = vld [vmem:[#allocation2 + $0x8] sm:$0xff]  ;;  %v121_v6 = vld [vmem:[%s248_s2] ss:$0 sm:$0xff] }
   0xf   :  { %77 = vmatpush.msra.mxu0 %v51_v1  ;;  %113 = vmatpush.msra.mxu1 %v51_v1 }
  0x11   :  { %78 = vmatpush.msra.mxu0 %v50_v2  ;;  %114 = vmatpush.msra.mxu1 %v50_v2 }
  0x13   :  { %79 = vmatpush.msra.mxu0 %v49_v3  ;;  %115 = vmatpush.msra.mxu1 %v49_v3 }
  0x14   :  { %110 = vmatmul.msk.f32.vlgmr.msra.gmra.mxu0 %vm57_vm0, %v47_v4  ;;  %111 = vmatmul.msk.f32.vlgmr.msra.gmra.mxu1 %vm57_vm0, %v48_v5 }
  0x91   :  { %v81_v7 = vpop.f32.mrf.mxu0  ;;  %v84_v8 = vpop.f32.mrf.mxu1 }
  0x92   :  { %v82_v9 = vadd.f32 %v121_v6, %v81_v7  ;;  %v85_v10 = vadd.f32 %v121_v6, %v84_v8 }
  0x94   :  { %88 = vst.msk [vmem:[#allocation7] sm:$0xff] %vm87_vm1, %v82_v9 }
  0x95   :  { %89 = vst.msk [vmem:[#allocation7 + $0x8] sm:$0xff] %vm87_vm1, %v85_v10 }
  0x96   :  { %102 = dma.vmem_to_hbm [thread:$0]  %s95_s25, 256, %s97_s28, [#allocation4], %s201_s20, %s201_s20, %s202_s21  }
  0x97   :  { %198 = dma.done.wait [#allocation4], 256  }
  0x98   :  { %199 = vsyncadd [#allocation4], 4294967040 }
  0x99   :  { %107 = vsyncpa [#allocation3], 1 }
  0x9a   :  { %108 = vsyncpa [#allocation6], 1 }
  0x9b   :  { %109 = vsyncpa [#allocation4], 1 }

</bundles_post_ra>
